<compile_context>
chip_gen: v7x
topology: tpu7x:2x2x1
jax: 0.10.0
libtpu: 0.0.40
codegen_flags: <defaults>
</compile_context>

<pallas_src>
import jax
import jax.numpy as jnp
from jax.experimental import pallas as pl
from jax.experimental.pallas import tpu as pltpu


def _cdiv(a, b):
    return -(-a // b)


def _critic_kernel(sa_ref, w1_ref, b1_ref, wh_ref, bh_ref, q_ref):
    """One batch tile (batch on lanes) of the dueling-critic forward."""
    # fc1 + ReLU: x = relu(W1 @ [state; action] + b1)                [F1, TB]
    x = jnp.dot(w1_ref[...], sa_ref[...], preferred_element_type=jnp.float32)
    x = jnp.maximum(x + b1_ref[...], 0.0)

    # Both heads in one MXU pass: rows [0:A) = advantage logits, row [A] = value.
    heads = jnp.dot(wh_ref[...], x, preferred_element_type=jnp.float32) + bh_ref[...]
    n_actions = wh_ref.shape[0] - 1                                   # static
    logits = heads[:n_actions, :]                                     # [A, TB]
    value = heads[n_actions:, :]                                      # [1, TB]

    # Dueling epilogue, simplified:
    #   max_j(value + softmax_j - mean(softmax)) == value - 1/A + max(softmax)
    #   max(softmax) == exp(0) / sum(exp(logits - max_logit)) == inv_denom
    m = jnp.max(logits, axis=0, keepdims=True)                        # [1, TB]
    denom = jnp.sum(jnp.exp(logits - m), axis=0, keepdims=True)       # [1, TB]
    inv_denom = pl.reciprocal(denom, approx=True)                     # EUP slot
    q_ref[...] = value + (inv_denom - (1.0 / n_actions))              # [1, TB]


def pack_params(params):
    """One-time wrapper-side packing into the transposed (batch-on-lanes) layout.

    Weights become [out, in]; biases become [out, 1]; the advantage head (A rows)
    and value head (1 row) are fused into a single [A+1, F1] matrix.
    """
    return {
        "w1": params["w1"].T,                                            # [F1, D+A]
        "b1": params["b1"].T,                                            # [F1, 1]
        "wh": jnp.concatenate([params["wqv"], params["wq"]], axis=1).T,  # [A+1, F1]
        "bh": jnp.concatenate([params["bqv"], params["bq"]], axis=1).T,  # [A+1, 1]
    }


def critic_forward(state, action, packed, *, block_b=2048):
    """Fused dueling-critic forward. Grids over batch (on the lane axis);
    weights/biases stay VMEM-resident across grid steps."""
    B, D = state.shape
    A = action.shape[1]
    F1 = packed["w1"].shape[0]

    LANE = 128
    n_blocks = _cdiv(B, LANE)                       # minimum 128-lane batch blocks
    max_blocks_per_tile = max(1, block_b // LANE)
    n_tiles = _cdiv(n_blocks, max_blocks_per_tile)
    if n_blocks >= 2:
        n_tiles = max(n_tiles, 2)                   # v7x: give both TensorCores work
    TB = _cdiv(n_blocks, n_tiles) * LANE
    Bp = TB * n_tiles

    # Pack [state | action] and transpose to batch-on-lanes [D+A, Bp].
    sa_t = jnp.concatenate([state, action], axis=1).T
    if Bp != B:
        sa_t = jnp.pad(sa_t, ((0, 0), (0, Bp - B)))

    const_spec = lambda arr: pl.BlockSpec(arr.shape, lambda i: (0, 0))

    flops = 2 * Bp * F1 * (D + A + A + 1)
    bytes_accessed = 4 * (sa_t.size + packed["w1"].size + packed["b1"].size
                          + packed["wh"].size + packed["bh"].size + Bp)

    out = pl.pallas_call(
        _critic_kernel,
        out_shape=jax.ShapeDtypeStruct((1, Bp), jnp.float32),
        grid=(n_tiles,),
        in_specs=[
            pl.BlockSpec((D + A, TB), lambda i: (0, i)),   # activations  [D+A, TB]
            const_spec(packed["w1"]),                      # fc1 weight, VMEM-resident
            const_spec(packed["b1"]),
            const_spec(packed["wh"]),                      # fused heads weight
            const_spec(packed["bh"]),
        ],
        out_specs=pl.BlockSpec((1, TB), lambda i: (0, i)),  # lane-dense output row
        compiler_params=pltpu.CompilerParams(
            dimension_semantics=("parallel",)),             # megacore split on v7x
        cost_estimate=pl.CostEstimate(
            flops=flops, transcendentals=Bp * A, bytes_accessed=bytes_accessed),
    )(sa_t, packed["w1"], packed["b1"], packed["wh"], packed["bh"])

    # Back to the module's [B, 1] layout (a row->column reshape, no real transpose).
    return out[0, :B][:, None]


def init_params(key, input_dims, fc1_dims, n_actions):
    """Deterministic init mimicking nn.Linear default U(-1/sqrt(fan_in), ...).

    Stored nn.Linear-style, pre-transposed as [in, out]; biases as [1, out].
    """
    def linear(k, fan_in, fan_out):
        kw, kb = jax.random.split(k)
        bound = 1.0 / jnp.sqrt(jnp.float32(fan_in))
        w = jax.random.uniform(kw, (fan_in, fan_out), jnp.float32, -bound, bound)
        b = jax.random.uniform(kb, (1, fan_out), jnp.float32, -bound, bound)
        return w, b

    k1, k2, k3, k4 = jax.random.split(key, 4)
    w1, b1 = linear(k1, input_dims + n_actions, fc1_dims)     # fc1
    wq, bq = linear(k2, fc1_dims, 1)                          # q (value head)
    wqv, bqv = linear(k3, fc1_dims, n_actions)                # q_values head
    # self.output = nn.Linear(n_actions, 1) is unused in forward(); init for parity.
    wout, bout = linear(k4, n_actions, 1)
    return {"w1": w1, "b1": b1, "wq": wq, "bq": bq,
            "wqv": wqv, "bqv": bqv, "wout": wout, "bout": bout}


def critic_forward_ref(state, action, params):
    """Pure-JAX reference of the same forward for a correctness check."""
    sa = jnp.concatenate([state, action], axis=1)
    x = jnp.maximum(sa @ params["w1"] + params["b1"], 0.0)
    value = x @ params["wq"] + params["bq"]
    q_values = jax.nn.softmax(x @ params["wqv"] + params["bqv"], axis=1)
    avg = jnp.mean(q_values, axis=1, keepdims=True)
    q = value + (q_values - avg)
    return jnp.max(q, axis=1, keepdims=True)


if __name__ == "__main__":
    # Small shapes consistent with the module:
    #   batch=8, input_dims=16, n_actions=4, fc1_dims=32
    B, INPUT_DIMS, N_ACTIONS, FC1_DIMS = 8, 16, 4, 32

    key = jax.random.PRNGKey(0)
    k_state, k_action, k_params = jax.random.split(key, 3)

    state = jax.random.normal(k_state, (B, INPUT_DIMS), jnp.float32)
    action = jax.random.normal(k_action, (B, N_ACTIONS), jnp.float32)
    params = init_params(k_params, INPUT_DIMS, FC1_DIMS, N_ACTIONS)
    packed = pack_params(params)

    q = critic_forward(state, action, packed)
    q = jax.block_until_ready(q)

    q_ref = critic_forward_ref(state, action, params)
    assert q.shape == (B, 1)
    # small tolerance for pl.reciprocal(approx=True) in max(softmax)
    assert jnp.allclose(q, q_ref, atol=2e-3, rtol=2e-3), "mismatch vs reference"

    print("KERNEL_OK")
</pallas_src>

<mosaic_0001>
module attributes {stable_mosaic.version = 11 : i64} {
  func.func @_critic_kernel(%arg0: i32, %arg1: memref<20x128xf32, #tpu.memory_space<vmem>>, %arg2: memref<32x20xf32, #tpu.memory_space<vmem>>, %arg3: memref<32x1xf32, #tpu.memory_space<vmem>>, %arg4: memref<5x32xf32, #tpu.memory_space<vmem>>, %arg5: memref<5x1xf32, #tpu.memory_space<vmem>>, %arg6: memref<1x128xf32, #tpu.memory_space<vmem>>) attributes {dimension_semantics = [#tpu.dimension_semantics<parallel>], iteration_bounds = array<i64: 1>, scalar_prefetch = 0 : i64, scratch_operands = 0 : i64, tpu.core_type = #tpu.core_type<tc>, window_params = [{transform_indices = @transform_0, window_bounds = array<i64: 20, 128>}, {pipeline_mode = #tpu.pipeline_mode<synchronous>, transform_indices = @transform_1, window_bounds = array<i64: 32, 20>}, {pipeline_mode = #tpu.pipeline_mode<synchronous>, transform_indices = @transform_2, window_bounds = array<i64: 32, 1>}, {pipeline_mode = #tpu.pipeline_mode<synchronous>, transform_indices = @transform_3, window_bounds = array<i64: 5, 32>}, {pipeline_mode = #tpu.pipeline_mode<synchronous>, transform_indices = @transform_4, window_bounds = array<i64: 5, 1>}, {transform_indices = @transform_5, window_bounds = array<i64: 1, 128>}]} {
    %c0 = arith.constant 0 : index
    %c0_0 = arith.constant 0 : index
    %0 = vector.load %arg2[%c0, %c0_0] : memref<32x20xf32, #tpu.memory_space<vmem>>, vector<32x20xf32>
    %c0_1 = arith.constant 0 : index
    %c0_2 = arith.constant 0 : index
    %1 = vector.load %arg1[%c0_1, %c0_2] : memref<20x128xf32, #tpu.memory_space<vmem>>, vector<20x128xf32>
    %cst = arith.constant dense<0.000000e+00> : vector<32x128xf32>
    %2 = tpu.matmul %0, %1, %cst {dimension_numbers = #tpu.dot_dimension_numbers<[1], [0], [0], [1], [0, 0, 1, 1], [], []>} : vector<32x20xf32>, vector<20x128xf32>, vector<32x128xf32> -> vector<32x128xf32>
    %c0_3 = arith.constant 0 : index
    %c0_4 = arith.constant 0 : index
    %3 = vector.load %arg3[%c0_3, %c0_4] : memref<32x1xf32, #tpu.memory_space<vmem>>, vector<32x1xf32>
    %4 = vector.broadcast %3 : vector<32x1xf32> to vector<32x128xf32>
    %5 = arith.addf %2, %4 : vector<32x128xf32>
    %cst_5 = arith.constant 0.000000e+00 : f32
    %6 = vector.broadcast %cst_5 : f32 to vector<32x128xf32>
    %7 = arith.maximumf %5, %6 : vector<32x128xf32>
    %c0_6 = arith.constant 0 : index
    %c0_7 = arith.constant 0 : index
    %8 = vector.load %arg4[%c0_6, %c0_7] : memref<5x32xf32, #tpu.memory_space<vmem>>, vector<5x32xf32>
    %cst_8 = arith.constant dense<0.000000e+00> : vector<5x128xf32>
    %9 = tpu.matmul %8, %7, %cst_8 {dimension_numbers = #tpu.dot_dimension_numbers<[1], [0], [0], [1], [0, 0, 1, 1], [], []>} : vector<5x32xf32>, vector<32x128xf32>, vector<5x128xf32> -> vector<5x128xf32>
    %c0_9 = arith.constant 0 : index
    %c0_10 = arith.constant 0 : index
    %10 = vector.load %arg5[%c0_9, %c0_10] : memref<5x1xf32, #tpu.memory_space<vmem>>, vector<5x1xf32>
    %11 = vector.broadcast %10 : vector<5x1xf32> to vector<5x128xf32>
    %12 = arith.addf %9, %11 : vector<5x128xf32>
    %13 = vector.extract_strided_slice %12 {offsets = [0, 0], sizes = [4, 128], strides = [1, 1]} : vector<5x128xf32> to vector<4x128xf32>
    %14 = vector.extract_strided_slice %12 {offsets = [4, 0], sizes = [1, 128], strides = [1, 1]} : vector<5x128xf32> to vector<1x128xf32>
    %cst_11 = arith.constant dense<0xFF800000> : vector<128xf32>
    %15 = vector.multi_reduction <maximumf>, %13, %cst_11 [0] : vector<4x128xf32> to vector<128xf32>
    %16 = vector.shape_cast %15 : vector<128xf32> to vector<1x128xf32>
    %17 = vector.broadcast %16 : vector<1x128xf32> to vector<4x128xf32>
    %18 = arith.subf %13, %17 : vector<4x128xf32>
    %19 = math.exp %18 : vector<4x128xf32>
    %cst_12 = arith.constant dense<0.000000e+00> : vector<128xf32>
    %20 = vector.multi_reduction <add>, %19, %cst_12 [0] : vector<4x128xf32> to vector<128xf32>
    %21 = vector.shape_cast %20 : vector<128xf32> to vector<1x128xf32>
    %22 = tpu.reciprocal %21 {approx = true} : vector<1x128xf32> -> vector<1x128xf32>
    %cst_13 = arith.constant 2.500000e-01 : f32
    %23 = vector.broadcast %cst_13 : f32 to vector<1x128xf32>
    %24 = arith.subf %22, %23 : vector<1x128xf32>
    %25 = arith.addf %14, %24 : vector<1x128xf32>
    %c0_14 = arith.constant 0 : index
    %c0_15 = arith.constant 0 : index
    %26 = vector.load %arg6[%c0_14, %c0_15] : memref<1x128xf32, #tpu.memory_space<vmem>>, vector<1x128xf32>
    tpu.vector_store %arg6[%c0_14, %c0_15], %25 {strides = array<i32>} : memref<1x128xf32, #tpu.memory_space<vmem>>, vector<1x128xf32>,
    return
  }
  func.func @transform_0(%arg0: i32) -> (i32, i32) {
    %c0_i32 = arith.constant 0 : i32
    %c0_i32_0 = arith.constant 0 : i32
    return %c0_i32, %arg0 : i32, i32
  }
  func.func @transform_1(%arg0: i32) -> (i32, i32) {
    %c0_i32 = arith.constant 0 : i32
    %c0_i32_0 = arith.constant 0 : i32
    %c0_i32_1 = arith.constant 0 : i32
    return %c0_i32, %c0_i32_0 : i32, i32
  }
  func.func @transform_2(%arg0: i32) -> (i32, i32) {
    %c0_i32 = arith.constant 0 : i32
    %c0_i32_0 = arith.constant 0 : i32
    %c0_i32_1 = arith.constant 0 : i32
    return %c0_i32, %c0_i32_0 : i32, i32
  }
  func.func @transform_3(%arg0: i32) -> (i32, i32) {
    %c0_i32 = arith.constant 0 : i32
    %c0_i32_0 = arith.constant 0 : i32
    %c0_i32_1 = arith.constant 0 : i32
    return %c0_i32, %c0_i32_0 : i32, i32
  }
  func.func @transform_4(%arg0: i32) -> (i32, i32) {
    %c0_i32 = arith.constant 0 : i32
    %c0_i32_0 = arith.constant 0 : i32
    %c0_i32_1 = arith.constant 0 : i32
    return %c0_i32, %c0_i32_0 : i32, i32
  }
  func.func @transform_5(%arg0: i32) -> (i32, i32) {
    %c0_i32 = arith.constant 0 : i32
    %c0_i32_0 = arith.constant 0 : i32
    return %c0_i32, %arg0 : i32, i32
  }
}

</mosaic_0001>

<bundles_post_ra>
// kernel: tpu_custom_call.1
= control target key start
LH: loop header
LB: loop body
LE: loop exit
PB: predicated region body
PF: predicated region fallthrough
CT: control target
= control target key end

     0   :  { %vm52_vm0 = vcmask 162816   ;;  %vm65_vm1 = vcmask 1043456   ;;  %v361_v5 = vmov 0   ;;  %s455_s0 = inlined_call_operand.vmem [shape: f32[20,128], index: 0, kind: input, shape index: {}]   ;;  %s456_s1 = inlined_call_operand.vmem [shape: f32[32,20], index: 1, kind: input, shape index: {}]   ;;  %s457_s2 = inlined_call_operand.vmem [shape: f32[32,1], index: 2, kind: input, shape index: {}]   ;;  %s458_s3 = inlined_call_operand.vmem [shape: f32[5,32], index: 3, kind: input, shape index: {}]   ;;  %s459_s4 = inlined_call_operand.vmem [shape: f32[5,1], index: 4, kind: input, shape index: {}]   ;;  %s460_s5 = inlined_call_operand.hbm [shape: f32[1,128], index: 5, kind: output, shape index: {}]  }
   0x1   :  { %v25_v0 = vld [vmem:[%s455_s0] sm:$0xff]  ;;  %v26_v1 = vld [vmem:[%s455_s0 + $0x8] sm:$0xff]  ;;  %v27_v4 = vld [vmem:[%s455_s0 + $0x10] sm:$0xf]  ;;  %331 = vset.pattern.permute.xlu0 %v361_v5  ;;  %332 = vset.pattern.permute.xlu1 %v361_v5 }
   0x2   :  { %v316_v2 = vpack.c.bf16 %v26_v1, %v25_v0  ;;  %v21_v3 = vld [vmem:[%s456_s1] sm:$0xff]  ;;  %v30_v7 = vld [vmem:[%s457_s2 + $0x10] sm:$0xff]  ;;  %v29_v8 = vld [vmem:[%s457_s2 + $0x8] sm:$0xff] }
   0x3   :  { %299 = vmatprep.mubr.msk.f32.mxu0 %vm52_vm0, %v21_v3  ;;  %v28_v6 = vld [vmem:[%s457_s2] sm:$0xff] }
   0x4   :  { %317 = vmatprep.subr.bf16.mxu0 %v316_v2  ;;  %34 = vperm.xlu0 %331, %v28_v6  }
   0x5   :  { %319 = vmatpush3.bf16.msra.mxu0 %v316_v2 }
   0x6   :  { %10 = vsyncpa [#allocation3], 0  ;;  %297 = vmatprep.subr.msk.mxu0 %vm65_vm1, %v27_v4  ;;  %44 = vperm.xlu1 %332, %v30_v7   ;;  %v22_v9 = vld [vmem:[%s456_s1 + $0x8] sm:$0xff]  ;;  %v31_v10 = vld [vmem:[%s457_s2 + $0x18] sm:$0xff]  ;;  %v362_v14 = vmov 0.0|0.0   ;;  %vm363_vm2 = vmmov 0  }
   0x7   :  { %v23_v11 = vld [vmem:[%s456_s1 + $0x10] sm:$0xff]  ;;  %v159_v12 = vld [vmem:[%s459_s4] sm:$0x1f]  ;;  %v24_v13 = vld [vmem:[%s456_s1 + $0x18] sm:$0xff]  ;;  %320 = vmatprep.subr.bf16.mxu1 %v362_v14  ;;  %v364_v15 = vmov 0.0   ;;  %vm165_vm3 = vcmask 261120  }
   0x8   :  { %39 = vperm.xlu0 %331, %v29_v8   ;;  %313 = vmatprep.mubr.msk.f32.mxu1 %vm363_vm2, %v364_v15  ;;  %v158_v34 = vld [vmem:[%s458_s3] sm:$0x1f]  ;;  %s365_s3 = smov [#allocation2]  }
   0x9   :  { %298 = vmatpush3.msk.msra.mxu0 %vm65_vm1, %v27_v4  ;;  %s266_s4 = sshll.u32 %s365_s3, 4  ;;  %s267_s4 = int_to_ptr.vmem [resolvable:$true] %s266_s4 }
   0xa   :  { %300 = vmatmul.mubr.msk.f32.vlgmr.msra.gmra.mrb[0].mxu0 %vm52_vm0, %v22_v9  ;;  %49 = vperm.xlu1 %332, %v31_v10   ;;  %s337_s16 = scalar_lea.vmem %s267_s4, 16  ;;  %s341_s17 = scalar_lea.vmem %s267_s4, 32 }
   0xb   :  { %302 = vmatprep.mubr.msk.f32.mxu0 %vm52_vm0, %v23_v11  ;;  %p338_p0 = scmp.ne.s32.totalorder %s267_s4, %s337_s16  ;;  %p342_p1 = scmp.lt.s32.totalorder %s267_s4, %s267_s4 }
   0xc   :  { %162 = vperm.xlu0 %331, %v159_v12   ;;  %p343_p2 = scmp.lt.s32.totalorder %s341_s17, %s337_s16 }
   0xe   :  { %303 = vmatmul.mubr.msk.f32.gmra.mrb[2].mxu0 %vm52_vm0, %v24_v13  ;;  %p344_p3 = por %p343_p2, %p342_p1 }
  0x10   :  { %p345_p4 = pnand %p344_p3, %p338_p0 }
  0x83   :  { %v35_v16 = vpop.permute.xlu0 %34 }
  0x85   :  { %v45_v17 = vpop.permute.xlu1 %44 }
  0x87   :  { %v40_v18 = vpop.permute.xlu0 %39 }
  0x89   :  { %v50_v24 = vpop.permute.xlu1 %49 }
  0x8b   :  { %v163_v35 = vpop.permute.xlu0 %162 }
  0xdd   :  { %v301_v19 = vpop.f32.mrb[0].mxu0 }
  0xde   :  { %v141_v20 = vadd.f32 %v301_v19, %v40_v18  ;;  %v135_v21 = vpop.f32.mrb[1].mxu0 }
  0xdf   :  { %v136_v22 = vadd.f32 %v135_v21, %v35_v16 }
  0xe0   :  { %v155_v23 = vmax.f32 %v141_v20, 0.0 }
  0xe1   :  { %v154_v25 = vmax.f32 %v136_v22, 0.0  ;;  %v304_v26 = vpop.f32.mrb[2].mxu0 }
  0xe2   :  { %v151_v27 = vadd.f32 %v304_v26, %v50_v24  ;;  %v145_v28 = vpop.f32.mrb[3].mxu0 }
  0xe3   :  { %v146_v29 = vadd.f32 %v145_v28, %v45_v17  ;;  %v321_v30 = vpack.c.bf16 %v155_v23, %v154_v25 }
  0xe4   :  { %v157_v31 = vmax.f32 %v151_v27, 0.0 }
  0xe5   :  { %v156_v32 = vmax.f32 %v146_v29, 0.0  ;;  %322 = vmatpush3.bf16.msra.mxu1 %v321_v30 }
  0xe6   :  { %323 = vmatprep.subr.bf16.mxu1 %v362_v14 }
  0xe7   :  { %v324_v33 = vpack.c.bf16 %v157_v31, %v156_v32 }
  0xe9   :  { %325 = vmatpush3.bf16.msra.mxu1 %v324_v33 }
  0xec   :  { %314 = vmatmul.mubr.msk.f32.vlgmr.msra.gmra.mrb[0].mxu1 %vm165_vm3, %v158_v34 }
 0x1bf   :  { %v235_v36 = vpop.f32.mrb[0].mxu1 }
 0x1c0   :  { %v236_v37 = vadd.f32 %v235_v36, %v163_v35  ;;  %v315_v38 = vpop.f32.mrb[1].mxu1 }
 0x1c2   :  { %v239_v39 = vsel %vm65_vm1, %v236_v37, -inf }
 0x1c3   :  { %v240_v40 = vrot.slane %v239_v39, 4 }
 0x1c5   :  { %v241_v41 = vmax.f32 %v239_v39, %v240_v40 }
 0x1c7   :  { %v242_v42 = vrot.slane %v241_v41, 2 }
 0x1c9   :  { %v243_v43 = vmax.f32 %v241_v41, %v242_v42 }
 0x1cb   :  { %v244_v44 = vrot.slane %v243_v43, 1 }
 0x1cd   :  { %v245_v45 = vmax.f32 %v243_v43, %v244_v44 }
 0x1cf   :  { %v246_v46 = vsub.f32 %v236_v37, %v245_v45 }
 0x1d1   :  { %v247_v47 = vmul.f32 1.442695, %v246_v46 }
 0x1d3   :  { %333 = vpow2.f32 %v247_v47 }
 0x1dd   :  { %v334_v48 = vpop.eup %333 }
 0x1de   :  { %v249_v49 = vsel %vm65_vm1, %v334_v48, 0.0 }
 0x1df   :  { %v250_v50 = vrot.slane %v249_v49, 4 }
 0x1e1   :  { %v251_v51 = vadd.f32 %v250_v50, %v249_v49 }
 0x1e3   :  { %v252_v52 = vrot.slane %v251_v51, 2 }
 0x1e5   :  { %v253_v53 = vadd.f32 %v252_v52, %v251_v51 }
 0x1e7   :  { %v254_v54 = vrot.slane %v253_v53, 1 }
 0x1e9   :  { %v255_v55 = vadd.f32 %v254_v54, %v253_v53 }
 0x1eb   :  { %335 = vrcp.f32 %v255_v55 }
 0x1f5   :  { %v336_v56 = vpop.eup %335 }
 0x1f6   :  { %v280_v57 = vadd.f32 -0.25, %v336_v56 }
 0x1f8   :  { %v258_v58 = vadd.f32 %v280_v57, %v236_v37 }
 0x1fa   :  { %259 = vst [vmem:[#allocation2 - $0x4] sm:$0x10] %v258_v58 }
 0x1fb   :  { %348 = shalt.err (!%p345_p4)
}
 0x1fc   :  { %s349_s20 = scalar_lea.hbm %s460_s5, 16 }
 0x1fd   :  { %p350_p5 = scmp.ne.s32.totalorder %s460_s5, %s349_s20  ;;  %p353_p6 = scmp.lt.u32.totalorder %s349_s20, %s460_s5 }
 0x1ff   :  { %p355_p7 = pnand %p353_p6, %p350_p5 }
 0x201   :  { %358 = shalt.err (!%p355_p7)
}
 0x202   :  { %269 = dma.vmem_to_hbm [thread:$0]  %s267_s4, 16, %s460_s5, [#allocation3]  }
 0x203   :  { %359 = dma.done.wait [#allocation3], 16  }
 0x204   :  { %360 = vsyncadd [#allocation3], 4294967280 }
 0x205   :  { %273 = vsyncpa [#allocation3], 1 }

</bundles_post_ra>
